<compile_context>
chip_gen: v7x
topology: tpu7x:2x2x1
jax: 0.10.0
libtpu: 0.0.40
codegen_flags: <defaults>
</compile_context>

<pallas_src>
import jax
import jax.numpy as jnp
from jax.experimental import pallas as pl
from jax.experimental.pallas import tpu as pltpu

# ------------------------- model hyper-parameters ---------------------------
SCALE_FACTOR = 0.18215
NUM_CLASSES = 512          # module default is 6736; small synthetic table
CONTEXT_DIM = 128          # embed_dim of attn_fusion / embedding dim
NUM_HEADS = 4              # irrelevant to the math with a single kv token

C_LR = 4                   # channels of z_lr
C_T = 4                    # channels of z_t
C_IN = C_LR + C_T          # channels of z_input = cat(z_lr, z_t)

BF = jnp.bfloat16


# =============================================================================
# Fused kernel: synthetic Transformer (2-layer MLP) + folded attn_fusion.
# Single grid step; every matmul is a batched (B, K) @ (K, 128) MXU op.
# =============================================================================
def fic_fused_kernel(x1_ref, w1_ref, b1_ref, w2_ref, b2_ref,
                     wvo_ref, bvo_ref, out_ref):
    D = CONTEXT_DIM
    x1 = x1_ref[...].astype(BF)                                   # (B, 136)

    # synthetic Transformer stand-in: 2-layer MLP on cat(c_t_embed, z_global)
    h = jnp.tanh(jnp.dot(x1, w1_ref[...],
                         preferred_element_type=jnp.float32) + b1_ref[...])
    c_cond = jnp.dot(h.astype(BF), w2_ref[...],
                     preferred_element_type=jnp.float32) + b2_ref[...]

    # attn_fusion with a single key/value token: softmax weight == 1, so the
    # output for every query position is C_cond @ (Wv @ Wo) + (bv @ Wo + bo),
    # with Wv@Wo / bv@Wo+bo folded offline into wvo / bvo.
    fused = jnp.dot(c_cond.astype(BF), wvo_ref[...],
                    preferred_element_type=jnp.float32) + bvo_ref[...]

    out_ref[:, :D] = fused                                        # (B, 128)
    out_ref[:, D:] = c_cond                                       # (B, 128)


def fic_fused_pallas(x1, w1, b1, w2, b2, w_vo, b_vo):
    B, K1 = x1.shape
    D = w2.shape[1]

    def full(shape):
        # single-step grid -> every block is the full array (lane-dense rows)
        return pl.BlockSpec(shape, lambda i: (0,) * len(shape))

    return pl.pallas_call(
        fic_fused_kernel,
        out_shape=jax.ShapeDtypeStruct((B, 2 * D), jnp.float32),
        grid=(1,),
        in_specs=[
            full((B, K1)),     # x1 = [c_t_embed | z_global*scale]   (B, 136)
            full((K1, D)),     # w1 (bf16)
            full((1, D)),      # b1
            full((D, D)),      # w2 (bf16)
            full((1, D)),      # b2
            full((D, D)),      # w_vo = Wv @ Wo (bf16)
            full((1, D)),      # b_vo = bv @ Wo + bo
        ],
        out_specs=full((B, 2 * D)),
        compiler_params=pltpu.CompilerParams(
            dimension_semantics=("arbitrary",)),
    )(x1, w1, b1, w2, b2, w_vo, b_vo)


# ----------------------------- parameters ------------------------------------
def init_params(key):
    ks = jax.random.split(key, 6)

    def nrm(k, shape, scale=0.02):
        return (scale * jax.random.normal(k, shape)).astype(jnp.float32)

    D = CONTEXT_DIM
    zeros = lambda s: jnp.zeros(s, jnp.float32)
    # q/k projections of the MHA are omitted: with a single key/value token the
    # softmax weight is exactly 1 and they cannot affect the output.
    return dict(
        embed=nrm(ks[0], (NUM_CLASSES, D)),
        tr_w1=nrm(ks[1], (D + C_IN, D)),
        tr_b1=zeros((1, D)),
        tr_w2=nrm(ks[2], (D, D)),
        tr_b2=zeros((1, D)),
        wv=nrm(ks[3], (D, D)), bv=zeros((1, D)),
        wo=nrm(ks[4], (D, D)), bo=zeros((1, D)),
    )


def pack_params(p):
    """One-time offline packing: fold Wv@Wo, pre-cast weights to bf16."""
    w_vo = p["wv"] @ p["wo"]                       # (D, D)
    b_vo = p["bv"] @ p["wo"] + p["bo"]             # (1, D)
    return dict(
        embed=p["embed"],
        w1=p["tr_w1"].astype(BF), b1=p["tr_b1"],
        w2=p["tr_w2"].astype(BF), b2=p["tr_b2"],
        w_vo=w_vo.astype(BF), b_vo=b_vo,
    )


# ----------------------------- forward (JAX glue) -----------------------------
def fic_forward(params, c_t, z_lr, z_t, t):
    # `t` (timesteps) only feeds the Unet, whose output is provably dead under
    # single-kv attention; TODO(synk): use it again when the real MoM_Unet is in.
    del t
    B, _, H, W = z_t.shape

    # F.interpolate(z_lr, size=z_t.shape[-2:]) -- default nearest (floor map)
    if z_lr.shape[-2:] != z_t.shape[-2:]:
        Hl, Wl = z_lr.shape[-2:]
        ridx = (jnp.arange(H) * Hl) // H
        cidx = (jnp.arange(W) * Wl) // W
        z_lr = z_lr[:, :, ridx][:, :, :, cidx]

    z_input = jnp.concatenate([z_lr, z_t], axis=1)             # (B, C_IN, H, W)
    # z_global = mean_{H,W}(scale * z_input); scale applied on the reduced row.
    z_global = jnp.mean(z_input, axis=(2, 3)) * SCALE_FACTOR   # (B, C_IN)

    c_t_embed = jnp.take(params["embed"], c_t, axis=0)         # (B, D)
    x1 = jnp.concatenate([c_t_embed, z_global], axis=-1)       # (B, D + C_IN)

    out = fic_fused_pallas(x1, params["w1"], params["b1"],
                           params["w2"], params["b2"],
                           params["w_vo"], params["b_vo"])     # (B, 2D)
    fused_row = out[:, :CONTEXT_DIM]                           # (B, D)
    c_cond = out[:, CONTEXT_DIM:]                              # (B, D)

    # Single-kv-token attention output is query-independent: every spatial
    # position of I_cond_fused equals the per-batch fused row.
    i_cond_fused = jnp.broadcast_to(
        fused_row.reshape(B, CONTEXT_DIM, 1, 1), (B, CONTEXT_DIM, H, W))
    return i_cond_fused, c_cond


if __name__ == "__main__":
    key = jax.random.PRNGKey(0)
    kp, k1, k2, k3 = jax.random.split(key, 4)
    params = pack_params(init_params(kp))

    B, H, W = 2, 16, 16
    c_t = jax.random.randint(k1, (B,), 0, NUM_CLASSES)                # (2,)
    z_lr = jax.random.normal(k2, (B, C_LR, 8, 8), jnp.float32)        # low-res
    z_t = jax.random.normal(k3, (B, C_T, H, W), jnp.float32)
    t = jnp.array([3, 17], dtype=jnp.int32)

    i_cond_fused, c_cond = jax.jit(fic_forward)(params, c_t, z_lr, z_t, t)
    jax.block_until_ready((i_cond_fused, c_cond))

    assert i_cond_fused.shape == (B, CONTEXT_DIM, H, W)
    assert c_cond.shape == (B, CONTEXT_DIM)
    assert bool(jnp.all(jnp.isfinite(i_cond_fused)))
    assert bool(jnp.all(jnp.isfinite(c_cond)))
    print("KERNEL_OK")
</pallas_src>

<mosaic_0001>
module attributes {stable_mosaic.version = 11 : i64} {
  func.func @fic_fused_kernel(%arg0: i32, %arg1: memref<2x136xf32, #tpu.memory_space<vmem>>, %arg2: memref<136x128xbf16, #tpu.memory_space<vmem>>, %arg3: memref<1x128xf32, #tpu.memory_space<vmem>>, %arg4: memref<128x128xbf16, #tpu.memory_space<vmem>>, %arg5: memref<1x128xf32, #tpu.memory_space<vmem>>, %arg6: memref<128x128xbf16, #tpu.memory_space<vmem>>, %arg7: memref<1x128xf32, #tpu.memory_space<vmem>>, %arg8: memref<2x256xf32, #tpu.memory_space<vmem>>) attributes {dimension_semantics = [#tpu.dimension_semantics<arbitrary>], iteration_bounds = array<i64: 1>, scalar_prefetch = 0 : i64, scratch_operands = 0 : i64, tpu.core_type = #tpu.core_type<tc>, window_params = [{pipeline_mode = #tpu.pipeline_mode<synchronous>, transform_indices = @transform_0, window_bounds = array<i64: 2, 136>}, {pipeline_mode = #tpu.pipeline_mode<synchronous>, transform_indices = @transform_1, window_bounds = array<i64: 136, 128>}, {pipeline_mode = #tpu.pipeline_mode<synchronous>, transform_indices = @transform_2, window_bounds = array<i64: 1, 128>}, {pipeline_mode = #tpu.pipeline_mode<synchronous>, transform_indices = @transform_3, window_bounds = array<i64: 128, 128>}, {pipeline_mode = #tpu.pipeline_mode<synchronous>, transform_indices = @transform_4, window_bounds = array<i64: 1, 128>}, {pipeline_mode = #tpu.pipeline_mode<synchronous>, transform_indices = @transform_5, window_bounds = array<i64: 128, 128>}, {pipeline_mode = #tpu.pipeline_mode<synchronous>, transform_indices = @transform_6, window_bounds = array<i64: 1, 128>}, {pipeline_mode = #tpu.pipeline_mode<synchronous>, transform_indices = @transform_7, window_bounds = array<i64: 2, 256>}]} {
    %c0 = arith.constant 0 : index
    %c0_0 = arith.constant 0 : index
    %0 = vector.load %arg1[%c0, %c0_0] : memref<2x136xf32, #tpu.memory_space<vmem>>, vector<2x136xf32>
    %1 = arith.truncf %0 : vector<2x136xf32> to vector<2x136xbf16>
    %c0_1 = arith.constant 0 : index
    %c0_2 = arith.constant 0 : index
    %2 = vector.load %arg2[%c0_1, %c0_2] : memref<136x128xbf16, #tpu.memory_space<vmem>>, vector<136x128xbf16>
    %cst = arith.constant dense<0.000000e+00> : vector<2x128xf32>
    %3 = tpu.matmul %1, %2, %cst {dimension_numbers = #tpu.dot_dimension_numbers<[1], [0], [0], [1], [0, 0, 1, 1], [], []>} : vector<2x136xbf16>, vector<136x128xbf16>, vector<2x128xf32> -> vector<2x128xf32>
    %c0_3 = arith.constant 0 : index
    %c0_4 = arith.constant 0 : index
    %4 = vector.load %arg3[%c0_3, %c0_4] : memref<1x128xf32, #tpu.memory_space<vmem>>, vector<1x128xf32>
    %5 = vector.broadcast %4 : vector<1x128xf32> to vector<2x128xf32>
    %6 = arith.addf %3, %5 : vector<2x128xf32>
    %7 = math.tanh %6 : vector<2x128xf32>
    %8 = arith.truncf %7 : vector<2x128xf32> to vector<2x128xbf16>
    %c0_5 = arith.constant 0 : index
    %c0_6 = arith.constant 0 : index
    %9 = vector.load %arg4[%c0_5, %c0_6] : memref<128x128xbf16, #tpu.memory_space<vmem>>, vector<128x128xbf16>
    %cst_7 = arith.constant dense<0.000000e+00> : vector<2x128xf32>
    %10 = tpu.matmul %8, %9, %cst_7 {dimension_numbers = #tpu.dot_dimension_numbers<[1], [0], [0], [1], [0, 0, 1, 1], [], []>} : vector<2x128xbf16>, vector<128x128xbf16>, vector<2x128xf32> -> vector<2x128xf32>
    %c0_8 = arith.constant 0 : index
    %c0_9 = arith.constant 0 : index
    %11 = vector.load %arg5[%c0_8, %c0_9] : memref<1x128xf32, #tpu.memory_space<vmem>>, vector<1x128xf32>
    %12 = vector.broadcast %11 : vector<1x128xf32> to vector<2x128xf32>
    %13 = arith.addf %10, %12 : vector<2x128xf32>
    %14 = arith.truncf %13 : vector<2x128xf32> to vector<2x128xbf16>
    %c0_10 = arith.constant 0 : index
    %c0_11 = arith.constant 0 : index
    %15 = vector.load %arg6[%c0_10, %c0_11] : memref<128x128xbf16, #tpu.memory_space<vmem>>, vector<128x128xbf16>
    %cst_12 = arith.constant dense<0.000000e+00> : vector<2x128xf32>
    %16 = tpu.matmul %14, %15, %cst_12 {dimension_numbers = #tpu.dot_dimension_numbers<[1], [0], [0], [1], [0, 0, 1, 1], [], []>} : vector<2x128xbf16>, vector<128x128xbf16>, vector<2x128xf32> -> vector<2x128xf32>
    %c0_13 = arith.constant 0 : index
    %c0_14 = arith.constant 0 : index
    %17 = vector.load %arg7[%c0_13, %c0_14] : memref<1x128xf32, #tpu.memory_space<vmem>>, vector<1x128xf32>
    %18 = vector.broadcast %17 : vector<1x128xf32> to vector<2x128xf32>
    %19 = arith.addf %16, %18 : vector<2x128xf32>
    %c0_15 = arith.constant 0 : index
    %c0_16 = arith.constant 0 : index
    %20 = vector.load %arg8[%c0_15, %c0_16] : memref<2x256xf32, #tpu.memory_space<vmem>>, vector<2x128xf32>
    tpu.vector_store %arg8[%c0_15, %c0_16], %19 {strides = array<i32>} : memref<2x256xf32, #tpu.memory_space<vmem>>, vector<2x128xf32>,
    %c0_17 = arith.constant 0 : index
    %c128 = arith.constant 128 : index
    %21 = vector.load %arg8[%c0_17, %c128] : memref<2x256xf32, #tpu.memory_space<vmem>>, vector<2x128xf32>
    tpu.vector_store %arg8[%c0_17, %c128], %13 {strides = array<i32>} : memref<2x256xf32, #tpu.memory_space<vmem>>, vector<2x128xf32>,
    return
  }
  func.func @transform_0(%arg0: i32) -> (i32, i32) {
    %c0_i32 = arith.constant 0 : i32
    %c0_i32_0 = arith.constant 0 : i32
    %c0_i32_1 = arith.constant 0 : i32
    return %c0_i32, %c0_i32_0 : i32, i32
  }
  func.func @transform_1(%arg0: i32) -> (i32, i32) {
    %c0_i32 = arith.constant 0 : i32
    %c0_i32_0 = arith.constant 0 : i32
    %c0_i32_1 = arith.constant 0 : i32
    return %c0_i32, %c0_i32_0 : i32, i32
  }
  func.func @transform_2(%arg0: i32) -> (i32, i32) {
    %c0_i32 = arith.constant 0 : i32
    %c0_i32_0 = arith.constant 0 : i32
    %c0_i32_1 = arith.constant 0 : i32
    return %c0_i32, %c0_i32_0 : i32, i32
  }
  func.func @transform_3(%arg0: i32) -> (i32, i32) {
    %c0_i32 = arith.constant 0 : i32
    %c0_i32_0 = arith.constant 0 : i32
    %c0_i32_1 = arith.constant 0 : i32
    return %c0_i32, %c0_i32_0 : i32, i32
  }
  func.func @transform_4(%arg0: i32) -> (i32, i32) {
    %c0_i32 = arith.constant 0 : i32
    %c0_i32_0 = arith.constant 0 : i32
    %c0_i32_1 = arith.constant 0 : i32
    return %c0_i32, %c0_i32_0 : i32, i32
  }
  func.func @transform_5(%arg0: i32) -> (i32, i32) {
    %c0_i32 = arith.constant 0 : i32
    %c0_i32_0 = arith.constant 0 : i32
    %c0_i32_1 = arith.constant 0 : i32
    return %c0_i32, %c0_i32_0 : i32, i32
  }
  func.func @transform_6(%arg0: i32) -> (i32, i32) {
    %c0_i32 = arith.constant 0 : i32
    %c0_i32_0 = arith.constant 0 : i32
    %c0_i32_1 = arith.constant 0 : i32
    return %c0_i32, %c0_i32_0 : i32, i32
  }
  func.func @transform_7(%arg0: i32) -> (i32, i32) {
    %c0_i32 = arith.constant 0 : i32
    %c0_i32_0 = arith.constant 0 : i32
    %c0_i32_1 = arith.constant 0 : i32
    return %c0_i32, %c0_i32_0 : i32, i32
  }
}

</mosaic_0001>

<bundles_post_ra>
// kernel: fic_forward.1
= control target key start
LH: loop header
LB: loop body
LE: loop exit
PB: predicated region body
PF: predicated region fallthrough
CT: control target
= control target key end

     0   :  { %v513_v0 = vmov 0   ;;  %v514_v2 = vmov 0.0   ;;  %vm116_vm0 = vcmask 64512   ;;  %vm120_vm1 = vcmask 1043456   ;;  %s669_s1 = inlined_call_operand.vmem [shape: bf16[136,128], index: 1, kind: input, shape index: {}]   ;;  %s670_s0 = inlined_call_operand.vmem [shape: f32[2,136], index: 0, kind: input, shape index: {}]   ;;  %s671_s3 = inlined_call_operand.vmem [shape: bf16[128,128], index: 3, kind: input, shape index: {}]   ;;  %s672_s5 = inlined_call_operand.vmem [shape: bf16[128,128], index: 5, kind: input, shape index: {}]   ;;  %s673_s2 = inlined_call_operand.vmem [shape: f32[1,128], index: 2, kind: input, shape index: {}]   ;;  %s674_s4 = inlined_call_operand.vmem [shape: f32[1,128], index: 4, kind: input, shape index: {}]   ;;  %s675_s7 = inlined_call_operand.vmem [shape: f32[2,256], index: 7, kind: output, shape index: {}]   ;;  %s676_s6 = inlined_call_operand.vmem [shape: f32[1,128], index: 6, kind: input, shape index: {}]  }
   0x1   :  { %124 = vmatprep.subr.bf16.mxu0 %v513_v0  ;;  %v486_v1 = vld [vmem:[%s669_s1] sm:$0xff]   ;;  %443 = vmatprep.subr.bf16.mxu1 %v514_v2  ;;  %v487_v3 = vld [vmem:[%s669_s1 + $0x8] sm:$0xff]   ;;  %v488_v4 = vld [vmem:[%s669_s1 + $0x10] sm:$0xff]   ;;  %vm515_vm2 = vmmov 0  }
   0x2   :  { %125 = vmatpush1.bf16.msra.mxu0 %v486_v1  ;;  %v489_v5 = vld [vmem:[%s669_s1 + $0x18] sm:$0xff]   ;;  %v395_v6 = vld.sshfl [vmem:[%s670_s0] sm:$0x33 pattern:$0x76325410]  ;;  %v496_v10 = vld [vmem:[%s671_s3 + $0x8] sm:$0xff]   ;;  %459 = vmatprep.mubr.msk.bf16.mxu1 %vm515_vm2, %v514_v2 }
   0x3   :  { %126 = vmatprep.subr.bf16.mxu0 %v513_v0  ;;  %v36_v7 = vcombine.high %v395_v6, %v395_v6  ;;  %v495_v8 = vld [vmem:[%s671_s3] sm:$0xff]   ;;  %v497_v12 = vld [vmem:[%s671_s3 + $0x10] sm:$0xff]   ;;  %v491_v13 = vld [vmem:[%s669_s1 + $0x28] sm:$0xff]   ;;  %v39_v19 = vpack.c.bf16 %v395_v6, %v395_v6 }
   0x4   :  { %444 = vmatpush3.bf16.msra.mxu1 %v495_v8  ;;  %v490_v11 = vld [vmem:[%s669_s1 + $0x20] sm:$0xff]   ;;  %v498_v14 = vld [vmem:[%s671_s3 + $0x18] sm:$0xff]   ;;  %v492_v15 = vld [vmem:[%s669_s1 + $0x30] sm:$0xff]  }
   0x5   :  { %v40_v9 = vpack.c.bf16 %v36_v7, %v36_v7  ;;  %445 = vmatprep.subr.bf16.mxu1 %v514_v2  ;;  %v493_v16 = vld [vmem:[%s669_s1 + $0x38] sm:$0xff]   ;;  %v494_v17 = vld [vmem:[%s669_s1 + $0x40] ss:$0 sps:$4 sm:$0xff]   ;;  %v500_v21 = vld [vmem:[%s671_s3 + $0x28] sm:$0xff]  }
   0x6   :  { %127 = vmatpush1.bf16.msra.mxu0 %v487_v3  ;;  %v122_v18 = vsel %vm120_vm1, %v494_v17, 0  ;;  %v499_v20 = vld [vmem:[%s671_s3 + $0x20] sm:$0xff]   ;;  %v501_v22 = vld [vmem:[%s671_s3 + $0x30] sm:$0xff]   ;;  %v502_v23 = vld [vmem:[%s671_s3 + $0x38] sm:$0xff]  }
   0x7   :  { %128 = vmatprep.subr.bf16.mxu0 %v513_v0  ;;  %406 = vmatprep.mubr.msk.bf16.mxu0 %vm116_vm0, %v40_v9  ;;  %v396_v24 = vld [vmem:[%s673_s2] ss:$0 sm:$0xff]  ;;  %v504_v33 = vld [vmem:[%s672_s5 + $0x8] sm:$0xff]   ;;  %v505_v34 = vld [vmem:[%s672_s5 + $0x10] sm:$0xff]  }
   0x8   :  { %446 = vmatpush3.bf16.msra.mxu1 %v496_v10  ;;  %v503_v31 = vld [vmem:[%s672_s5] sm:$0xff]   ;;  %v506_v35 = vld [vmem:[%s672_s5 + $0x18] sm:$0xff]   ;;  %v508_v37 = vld [vmem:[%s672_s5 + $0x28] sm:$0xff]  }
   0x9   :  { %447 = vmatprep.subr.bf16.mxu1 %v514_v2  ;;  %v507_v36 = vld [vmem:[%s672_s5 + $0x20] sm:$0xff]   ;;  %v509_v38 = vld [vmem:[%s672_s5 + $0x30] sm:$0xff]   ;;  %v510_v39 = vld [vmem:[%s672_s5 + $0x38] sm:$0xff]  }
   0xa   :  { %129 = vmatpush1.bf16.msra.mxu0 %v488_v4  ;;  %v407_v40 = vld [vmem:[%s674_s4] ss:$0 sm:$0xff] }
   0xb   :  { %130 = vmatprep.subr.bf16.mxu0 %v513_v0  ;;  %v416_v47 = vld [vmem:[%s676_s6] ss:$0 sm:$0xff] }
   0xc   :  { %448 = vmatpush3.bf16.msra.mxu1 %v497_v12 }
   0xd   :  { %449 = vmatprep.subr.bf16.mxu1 %v514_v2 }
   0xe   :  { %131 = vmatpush1.bf16.msra.mxu0 %v489_v5 }
   0xf   :  { %132 = vmatprep.subr.bf16.mxu0 %v513_v0 }
  0x10   :  { %450 = vmatpush3.bf16.msra.mxu1 %v498_v14 }
  0x11   :  { %451 = vmatprep.subr.bf16.mxu1 %v514_v2 }
  0x12   :  { %133 = vmatpush1.bf16.msra.mxu0 %v490_v11 }
  0x13   :  { %134 = vmatprep.subr.bf16.mxu0 %v513_v0 }
  0x14   :  { %452 = vmatpush3.bf16.msra.mxu1 %v499_v20 }
  0x15   :  { %453 = vmatprep.subr.bf16.mxu1 %v514_v2 }
  0x16   :  { %135 = vmatpush1.bf16.msra.mxu0 %v491_v13 }
  0x17   :  { %136 = vmatprep.subr.bf16.mxu0 %v513_v0 }
  0x18   :  { %454 = vmatpush3.bf16.msra.mxu1 %v500_v21 }
  0x19   :  { %455 = vmatprep.subr.bf16.mxu1 %v514_v2 }
  0x1a   :  { %137 = vmatpush1.bf16.msra.mxu0 %v492_v15 }
  0x1b   :  { %138 = vmatprep.subr.bf16.mxu0 %v513_v0 }
  0x1c   :  { %456 = vmatpush3.bf16.msra.mxu1 %v501_v22 }
  0x1d   :  { %457 = vmatprep.subr.bf16.mxu1 %v514_v2 }
  0x1e   :  { %139 = vmatpush1.bf16.msra.mxu0 %v493_v16 }
  0x1f   :  { %140 = vmatprep.subr.bf16.mxu0 %v513_v0 }
  0x20   :  { %458 = vmatpush3.bf16.msra.mxu1 %v502_v23 }
  0x21   :  { %463 = vmatprep.subr.bf16.mxu1 %v514_v2 }
  0x22   :  { %141 = vmatpush1.bf16.msra.mxu0 %v122_v18 }
  0x25   :  { %157 = vmatmul.mubr.bf16.vlgmr.msra.gmra.mrb[0].mxu0 %v39_v19 }
  0xf8   :  { %v158_v25 = vpop.f32.mrb[0].mxu0 }
  0xf9   :  { %v159_v26 = vadd.f32 %v396_v24, %v158_v25  ;;  %v160_v27 = vpop.f32.mrb[1].mxu0 }
  0xfa   :  { %v161_v28 = vpop.f32.mrb[2].mxu0 }
  0xfb   :  { %511 = vtanh.f32 %v159_v26  ;;  %v162_v29 = vpop.f32.mrb[3].mxu0 }
 0x105   :  { %v512_v30 = vpop.eup %511 }
 0x106   :  { %v165_v32 = vpack.c.bf16 %v512_v30, %v512_v30 }
 0x108   :  { %460 = vmatmul.mubr.bf16.vlgmr.msra.gmra.mrb[0].mxu1 %v165_v32 }
 0x109   :  { %464 = vmatpush3.bf16.msra.mxu1 %v503_v31  ;;  %479 = vmatprep.mubr.msk.bf16.mxu1 %vm515_vm2, %v514_v2 }
 0x10a   :  { %465 = vmatprep.subr.bf16.mxu1 %v514_v2 }
 0x10d   :  { %466 = vmatpush3.bf16.msra.mxu1 %v504_v33 }
 0x10e   :  { %467 = vmatprep.subr.bf16.mxu1 %v514_v2 }
 0x111   :  { %468 = vmatpush3.bf16.msra.mxu1 %v505_v34 }
 0x112   :  { %469 = vmatprep.subr.bf16.mxu1 %v514_v2 }
 0x115   :  { %470 = vmatpush3.bf16.msra.mxu1 %v506_v35 }
 0x116   :  { %471 = vmatprep.subr.bf16.mxu1 %v514_v2 }
 0x119   :  { %472 = vmatpush3.bf16.msra.mxu1 %v507_v36 }
 0x11a   :  { %473 = vmatprep.subr.bf16.mxu1 %v514_v2 }
 0x11d   :  { %474 = vmatpush3.bf16.msra.mxu1 %v508_v37 }
 0x11e   :  { %475 = vmatprep.subr.bf16.mxu1 %v514_v2 }
 0x121   :  { %476 = vmatpush3.bf16.msra.mxu1 %v509_v38 }
 0x122   :  { %477 = vmatprep.subr.bf16.mxu1 %v514_v2 }
 0x125   :  { %478 = vmatpush3.bf16.msra.mxu1 %v510_v39 }
 0x1db   :  { %v271_v41 = vpop.f32.mrb[0].mxu1 }
 0x1dc   :  { %v272_v42 = vadd.f32 %v407_v40, %v271_v41  ;;  %v461_v43 = vpop.f32.mrb[1].mxu1 }
 0x1dd   :  { %v274_v44 = vpop.f32.mrb[2].mxu1 }
 0x1de   :  { %v277_v45 = vpack.c.bf16 %v272_v42, %v272_v42  ;;  %390 = vst [vmem:[%s675_s7 + $0x2] sm:$0x3] %v272_v42  ;;  %v462_v46 = vpop.f32.mrb[3].mxu1 }
 0x1e0   :  { %480 = vmatmul.mubr.bf16.vlgmr.msra.gmra.mrb[4].mxu1 %v277_v45 }
 0x2b3   :  { %v383_v48 = vpop.f32.mrb[4].mxu1 }
 0x2b4   :  { %v384_v49 = vadd.f32 %v416_v47, %v383_v48  ;;  %v481_v50 = vpop.f32.mrb[5].mxu1 }
 0x2b5   :  { %v386_v51 = vpop.f32.mrb[6].mxu1 }
 0x2b6   :  { %389 = vst [vmem:[%s675_s7] sm:$0x3] %v384_v49  ;;  %v482_v52 = vpop.f32.mrb[7].mxu1 }

</bundles_post_ra>
